<compile_context>
chip_gen: v6e
topology: v6e:2x2x1
jax: 0.10.0
libtpu: 0.0.40
codegen_flags: <defaults>
</compile_context>

<pallas_src>
import functools
import math

import jax
import jax.numpy as jnp
from jax import lax
from jax.experimental import pallas as pl
from jax.experimental.pallas import tpu as pltpu


def _round_up(x, m):
    return ((x + m - 1) // m) * m


def _sublane_multiple(dtype):
    # minimum second-to-last tile dim: 8 rows for 32-bit, 16 for bf16, 32 for int8
    itemsize = jnp.dtype(dtype).itemsize
    return 8 * max(1, 4 // itemsize)


def _vmem_capacity_bytes():
    try:
        return int(pltpu.get_tpu_info().vmem_capacity_bytes)
    except Exception:
        return 64 * 1024 * 1024  # conservative default (v7x per-TC size)


# ---------------------------------------------------------------------------
# Path A: VMEM-resident table + one-hot MXU gather (TB tokens per grid step).
# ---------------------------------------------------------------------------
def _resident_kernel(ids_ref, table_ref, o_ref, *, scale):
    tb = o_ref.shape[0]
    vocab = table_ref.shape[0]
    ids = ids_ref[...]                                         # (tb, 1) int32
    cols = lax.broadcasted_iota(jnp.int32, (tb, vocab), 1)     # (tb, vocab)
    onehot = (cols == ids).astype(table_ref.dtype)             # exact 0/1 selector
    rows = jnp.dot(onehot, table_ref[...], preferred_element_type=jnp.float32)
    o_ref[...] = (rows * scale).astype(o_ref.dtype)


def _embed_resident(ids_flat, table, scale, block_tokens):
    n = ids_flat.shape[0]
    vocab, d_model = table.shape
    sub = _sublane_multiple(table.dtype)
    tb = max(sub, min(_round_up(block_tokens, sub), _round_up(n, sub)))
    n_pad = _round_up(n, tb)
    ids_pad = jnp.pad(ids_flat, (0, n_pad - n)).reshape(n_pad, 1)

    itemsize = jnp.dtype(table.dtype).itemsize
    table_bytes = vocab * d_model * itemsize
    vmem_limit = int(
        2 * table_bytes                      # resident table (+ buffering slack)
        + 2 * tb * d_model * itemsize        # double-buffered output blocks
        + 2 * tb * vocab * 4                 # one-hot intermediate headroom
        + 2 * tb * 4                         # ids blocks
        + (8 << 20)                          # compiler scratch headroom
    )
    vmem_limit = min(vmem_limit, int(_vmem_capacity_bytes() * 0.9))

    out = pl.pallas_call(
        functools.partial(_resident_kernel, scale=scale),
        out_shape=jax.ShapeDtypeStruct((n_pad, d_model), table.dtype),
        grid=(n_pad // tb,),
        in_specs=[
            pl.BlockSpec((tb, 1), lambda i: (i, 0)),            # ids block (VMEM)
            pl.BlockSpec((vocab, d_model), lambda i: (0, 0)),   # table: DMA'd once, reused
        ],
        out_specs=pl.BlockSpec((tb, d_model), lambda i: (i, 0)),
        compiler_params=pltpu.CompilerParams(
            # Token blocks are independent. (v7x dual-TC sharding via CORE_PARALLEL /
            # core_map would be a further win but is left generation-neutral here.)
            dimension_semantics=("parallel",),
            vmem_limit_bytes=vmem_limit,
        ),
    )(ids_pad, table)
    return out[:n]


# ---------------------------------------------------------------------------
# Path B: HBM table + manual double-buffered per-row DMA gather.
# ---------------------------------------------------------------------------
def _gather_kernel(ids_ref, table_ref, o_ref, buf, sem, *, scale, tb):
    # ids_ref:   SMEM (n_pad + tb,) scalar-prefetched token ids
    # table_ref: HBM  (vocab, d_model) embedding table (memory_space=pl.ANY)
    # o_ref:     VMEM (tb, d_model) output block for this step
    # buf:       VMEM (2, tb, d_model) double buffer of gathered rows
    # sem:       DMA semaphores, one per buffer slot
    i = pl.program_id(0)
    nsteps = pl.num_programs(0)
    slot = i % 2

    def row_copy(block, t, slot_):
        row = ids_ref[block * tb + t]
        return pltpu.make_async_copy(
            table_ref.at[pl.ds(row, 1), :],
            buf.at[slot_, pl.ds(t, 1), :],
            sem.at[slot_],
        )

    def issue(block, slot_):
        def body(t, carry):
            row_copy(block, t, slot_).start()
            return carry
        lax.fori_loop(0, tb, body, 0)

    def wait_all(block, slot_):
        def body(t, carry):
            row_copy(block, t, slot_).wait()
            return carry
        lax.fori_loop(0, tb, body, 0)

    @pl.when(i == 0)
    def _():
        issue(0, 0)                       # prime slot 0 with the first token block

    @pl.when(i + 1 < nsteps)
    def _():
        issue(i + 1, 1 - slot)            # prefetch next block while this one computes

    wait_all(i, slot)                     # all tb rows of this block have landed
    o_ref[...] = (buf[slot].astype(jnp.float32) * scale).astype(o_ref.dtype)


def _embed_gather(ids_flat, table, scale, block_tokens):
    n = ids_flat.shape[0]
    vocab, d_model = table.shape
    sub = _sublane_multiple(table.dtype)
    tb = max(sub, min(_round_up(block_tokens, sub), _round_up(n, sub)))
    n_pad = _round_up(n, tb)
    # pad by an extra tb so the (never-taken) prefetch branch of the last step
    # still reads in-bounds ids (value 0, a valid clamped id)
    ids_pad = jnp.pad(ids_flat, (0, n_pad - n + tb))

    itemsize = jnp.dtype(table.dtype).itemsize
    vmem_limit = int(
        2 * tb * d_model * itemsize        # gathered-row double buffer
        + 2 * tb * d_model * itemsize      # double-buffered output blocks
        + (4 << 20)                        # headroom
    )
    vmem_limit = min(vmem_limit, int(_vmem_capacity_bytes() * 0.9))

    out = pl.pallas_call(
        functools.partial(_gather_kernel, scale=scale, tb=tb),
        out_shape=jax.ShapeDtypeStruct((n_pad, d_model), table.dtype),
        grid_spec=pltpu.PrefetchScalarGridSpec(
            num_scalar_prefetch=1,                          # ids -> SMEM
            grid=(n_pad // tb,),
            in_specs=[pl.BlockSpec(memory_space=pl.ANY)],   # table stays in HBM
            out_specs=pl.BlockSpec((tb, d_model), lambda i, ids: (i, 0)),
            scratch_shapes=[
                pltpu.VMEM((2, tb, d_model), table.dtype),
                pltpu.SemaphoreType.DMA((2,)),
            ],
        ),
        compiler_params=pltpu.CompilerParams(
            dimension_semantics=("arbitrary",),   # manual double-buffer carries state
            vmem_limit_bytes=vmem_limit,
        ),
    )(ids_pad, table)
    return out[:n]


# ---------------------------------------------------------------------------
# Public wrapper: out = embedding[ids] * sqrt(d_model)
# ---------------------------------------------------------------------------
def input_embedding(ids, embedding, *, block_tokens=256, force_gather=False):
    """ids: (batch, seq) int token ids; embedding: (vocab_size, d_model)."""
    batch, seq = ids.shape
    vocab, d_model = embedding.shape
    n = batch * seq
    scale = math.sqrt(float(d_model))

    # clamp out-of-range ids so they can never drive an out-of-bounds HBM DMA
    ids_flat = jnp.clip(ids.reshape(n).astype(jnp.int32), 0, vocab - 1)

    itemsize = jnp.dtype(embedding.dtype).itemsize
    table_bytes = vocab * d_model * itemsize
    # keep the table VMEM-resident only while it uses <= 1/4 of this chip's VMEM
    # (v7x: ~16 MiB budget; v5e/v6e: ~32 MiB)
    resident_budget = _vmem_capacity_bytes() // 4

    if (not force_gather) and table_bytes <= resident_budget:
        out = _embed_resident(ids_flat, embedding, scale, block_tokens)
    else:
        # gather path scalar-prefetches ids into SMEM -> bound tokens per pallas_call
        max_tokens = 32768
        if n <= max_tokens:
            out = _embed_gather(ids_flat, embedding, scale, block_tokens)
        else:
            parts = [
                _embed_gather(ids_flat[s:s + max_tokens], embedding, scale, block_tokens)
                for s in range(0, n, max_tokens)
            ]
            out = jnp.concatenate(parts, axis=0)

    return out.reshape(batch, seq, d_model)


if __name__ == "__main__":
    # Small shapes consistent with the module.
    batch, seq = 2, 8
    d_model, vocab_size = 128, 512

    key = jax.random.PRNGKey(0)
    kids, kemb = jax.random.split(key)
    ids = jax.random.randint(kids, (batch, seq), 0, vocab_size, dtype=jnp.int32)
    # mimic nn.Embedding default init: N(0, 1)
    embedding = jax.random.normal(kemb, (vocab_size, d_model), dtype=jnp.float32)

    # pure-JAX reference
    ref = embedding[ids] * (d_model ** 0.5)

    # Path A (resident table) — the path the demo shape takes
    out = jax.block_until_ready(input_embedding(ids, embedding))
    assert out.shape == (batch, seq, d_model)
    assert jnp.allclose(out, ref, atol=1e-5, rtol=1e-5)

    # Path B (HBM row-gather fallback) — exercised explicitly so it stays validated
    out_g = jax.block_until_ready(input_embedding(ids, embedding, force_gather=True))
    assert jnp.allclose(out_g, ref, atol=1e-5, rtol=1e-5)

    print("KERNEL_OK")
</pallas_src>

<mosaic_0001>
module attributes {stable_mosaic.version = 11 : i64} {
  func.func @_resident_kernel(%arg0: i32, %arg1: memref<16x1xi32, #tpu.memory_space<vmem>>, %arg2: memref<512x128xf32, #tpu.memory_space<vmem>>, %arg3: memref<16x128xf32, #tpu.memory_space<vmem>>) attributes {dimension_semantics = [#tpu.dimension_semantics<parallel>], iteration_bounds = array<i64: 1>, scalar_prefetch = 0 : i64, scratch_operands = 0 : i64, tpu.core_type = #tpu.core_type<tc>, window_params = [{transform_indices = @transform_0, window_bounds = array<i64: 16, 1>}, {pipeline_mode = #tpu.pipeline_mode<synchronous>, transform_indices = @transform_1, window_bounds = array<i64: 512, 128>}, {transform_indices = @transform_2, window_bounds = array<i64: 16, 128>}]} {
    %c0 = arith.constant 0 : index
    %c0_0 = arith.constant 0 : index
    %0 = vector.load %arg1[%c0, %c0_0] : memref<16x1xi32, #tpu.memory_space<vmem>>, vector<16x1xi32>
    %1 = tpu.iota {dimensions = array<i32: 1>} : vector<16x512xi32>
    %2 = vector.broadcast %0 : vector<16x1xi32> to vector<16x512xi32>
    %3 = arith.cmpi eq, %1, %2 : vector<16x512xi32>
    %4 = arith.extui %3 : vector<16x512xi1> to vector<16x512xi32>
    %5 = arith.sitofp %4 : vector<16x512xi32> to vector<16x512xf32>
    %c0_1 = arith.constant 0 : index
    %c0_2 = arith.constant 0 : index
    %6 = vector.load %arg2[%c0_1, %c0_2] : memref<512x128xf32, #tpu.memory_space<vmem>>, vector<512x128xf32>
    %cst = arith.constant dense<0.000000e+00> : vector<16x128xf32>
    %7 = tpu.matmul %5, %6, %cst {dimension_numbers = #tpu.dot_dimension_numbers<[1], [0], [0], [1], [0, 0, 1, 1], [], []>} : vector<16x512xf32>, vector<512x128xf32>, vector<16x128xf32> -> vector<16x128xf32>
    %cst_3 = arith.constant 11.3137083 : f32
    %8 = vector.broadcast %cst_3 : f32 to vector<16x128xf32>
    %9 = arith.mulf %7, %8 : vector<16x128xf32>
    %c0_4 = arith.constant 0 : index
    %c0_5 = arith.constant 0 : index
    %10 = vector.load %arg3[%c0_4, %c0_5] : memref<16x128xf32, #tpu.memory_space<vmem>>, vector<16x128xf32>
    tpu.vector_store %arg3[%c0_4, %c0_5], %9 {strides = array<i32>} : memref<16x128xf32, #tpu.memory_space<vmem>>, vector<16x128xf32>,
    return
  }
  func.func @transform_0(%arg0: i32) -> (i32, i32) {
    %c0_i32 = arith.constant 0 : i32
    %c0_i32_0 = arith.constant 0 : i32
    return %arg0, %c0_i32 : i32, i32
  }
  func.func @transform_1(%arg0: i32) -> (i32, i32) {
    %c0_i32 = arith.constant 0 : i32
    %c0_i32_0 = arith.constant 0 : i32
    %c0_i32_1 = arith.constant 0 : i32
    return %c0_i32, %c0_i32_0 : i32, i32
  }
  func.func @transform_2(%arg0: i32) -> (i32, i32) {
    %c0_i32 = arith.constant 0 : i32
    %c0_i32_0 = arith.constant 0 : i32
    return %arg0, %c0_i32 : i32, i32
  }
}

</mosaic_0001>

<bundles_post_ra>
// kernel: tpu_custom_call.1
= control target key start
LH: loop header
LB: loop body
LE: loop exit
PB: predicated region body
PF: predicated region fallthrough
CT: control target
= control target key end

     0   :  { %7 = vsyncpa [#allocation3], 0  ;;  %s480_s0 = inlined_call_operand.vmem [shape: s32[16,1], index: 0, kind: input, shape index: {}]   ;;  %s481_s1 = inlined_call_operand.hbm [shape: f32[512,128], index: 1, kind: input, shape index: {}]   ;;  %s482_s2 = inlined_call_operand.hbm [shape: f32[16,128], index: 2, kind: output, shape index: {}]  }
   0x1   :  { %8 = vsyncpa [#allocation4], 0  ;;  %s441_s9 = smov [#allocation2]  }
   0x2   :  { %s16_s10 = sshll.u32 %s441_s9, 4  ;;  %s17_s10 = int_to_ptr.vmem [resolvable:$true] %s16_s10 }
   0x3   :  { %s405_s11 = scalar_lea.vmem %s17_s10, 8192  ;;  %p410_p1 = scmp.lt.s32.totalorder %s17_s10, %s17_s10 }
   0x4   :  { %p406_p0 = scmp.ne.s32.totalorder %s17_s10, %s405_s11  ;;  %p411_p2 = scmp.lt.s32.totalorder %s405_s11, %s405_s11 }
   0x6   :  { %p412_p3 = por %p411_p2, %p410_p1 }
   0x8   :  { %p413_p4 = pnand %p412_p3, %p406_p0 }
   0xa   :  { %416 = shalt.err (!%p413_p4)
}
   0xb   :  { %s442_s12 = smov 128   ;;  %s443_s13 = smov 8  }
   0xc   :  { %22 = dma.hbm_to_vmem [thread:$0]  %s481_s1, 8192, %s17_s10, [#allocation3], %s442_s12, %s442_s12, %s443_s13  }
   0xd   :  { %437 = dma.done.wait [#allocation3], 8192  }
   0xe   :  { %438 = vsyncadd [#allocation3], 4294959104  ;;  %v444_v0 = vmov 0   ;;  %v26_v1 = vld [vmem:[%s480_s0] sm:$0xff]  ;;  %v27_v2 = vld [vmem:[%s480_s0 + $0x8] sm:$0xff]  ;;  %s446_s0 = smov [#allocation5]  }
   0xf   :  { %396 = vset.pattern.permute.xlu0 %v444_v0  ;;  %v94_v3 = vld [vmem:[#allocation2 + $0xf8] sm:$0xff]  ;;  %v93_v7 = vld [vmem:[#allocation2 + $0xf0] sm:$0xff]  ;;  %v92_v11 = vld [vmem:[#allocation2 + $0xe8] sm:$0xff]  ;;  %s286_s1 = sshll.u32 %s446_s0, 4  ;;  %s287_s1 = int_to_ptr.vmem [resolvable:$true] %s286_s1 }
  0x10   :  { %34 = vperm.xlu0 %396, %v26_v1   ;;  %314 = vmatprep.subr.mxu0 %v94_v3  ;;  %v126_v4 = vld [vmem:[#allocation2 + $0x1f8] sm:$0xff]  ;;  %v125_v8 = vld [vmem:[#allocation2 + $0x1f0] sm:$0xff]  ;;  %v124_v12 = vld [vmem:[#allocation2 + $0x1e8] sm:$0xff]  ;;  %v28_v3 = vlaneseq  ;;  %s417_s20 = scalar_lea.vmem %s287_s1, 256  ;;  %p422_p6 = scmp.lt.s32.totalorder %s287_s1, %s287_s1 }
  0x11   :  { %v78_v5 = vld [vmem:[#allocation2 + $0x78] sm:$0xff]  ;;  %352 = vmatprep.subr.mxu1 %v126_v4  ;;  %v77_v9 = vld [vmem:[#allocation2 + $0x70] sm:$0xff]  ;;  %v76_v13 = vld [vmem:[#allocation2 + $0x68] sm:$0xff]  ;;  %p418_p5 = scmp.ne.s32.totalorder %s287_s1, %s417_s20  ;;  %p423_p7 = scmp.lt.s32.totalorder %s417_s20, %s417_s20 }
  0x12   :  { %v110_v6 = vld [vmem:[#allocation2 + $0x178] sm:$0xff]  ;;  %315 = vmatpush3.msra.mxu0 %v78_v5  ;;  %v109_v10 = vld [vmem:[#allocation2 + $0x170] sm:$0xff]  ;;  %v108_v14 = vld [vmem:[#allocation2 + $0x168] sm:$0xff]  ;;  %v29_v4 = vand.u32 127, %v28_v3 }
  0x13   :  { %353 = vmatpush3.msra.mxu1 %v110_v6  ;;  %316 = vmatprep.subr.mxu0 %v93_v7  ;;  %v91_v15 = vld [vmem:[#allocation2 + $0xe0] sm:$0xff]  ;;  %v90_v19 = vld [vmem:[#allocation2 + $0xd8] sm:$0xff]  ;;  %v89_v23 = vld [vmem:[#allocation2 + $0xd0] sm:$0xff]  ;;  %p424_p8 = por %p423_p7, %p422_p6 }
  0x14   :  { %354 = vmatprep.subr.mxu1 %v125_v8  ;;  %317 = vmatpush3.msra.mxu0 %v77_v9  ;;  %v123_v16 = vld [vmem:[#allocation2 + $0x1e0] sm:$0xff]  ;;  %v122_v20 = vld [vmem:[#allocation2 + $0x1d8] sm:$0xff]  ;;  %v121_v24 = vld [vmem:[#allocation2 + $0x1d0] sm:$0xff]  ;;  %v30_v5 = vadd.s32 128, %v29_v4  ;;  %v32_v6 = vadd.s32 384, %v29_v4  ;;  %v31_v7 = vadd.s32 256, %v29_v4 }
  0x15   :  { %37 = vperm.xlu0 %396, %v27_v2   ;;  %355 = vmatpush3.msra.mxu1 %v109_v10  ;;  %v75_v17 = vld [vmem:[#allocation2 + $0x60] sm:$0xff]  ;;  %v74_v21 = vld [vmem:[#allocation2 + $0x58] sm:$0xff]  ;;  %v73_v25 = vld [vmem:[#allocation2 + $0x50] sm:$0xff]  ;;  %v445_v9 = vmov 1.0   ;;  %p425_p9 = pnand %p424_p8, %p418_p5 }
  0x16   :  { %318 = vmatprep.subr.mxu0 %v92_v11  ;;  %356 = vmatprep.subr.mxu1 %v124_v12  ;;  %v107_v18 = vld [vmem:[#allocation2 + $0x160] sm:$0xff]  ;;  %v106_v22 = vld [vmem:[#allocation2 + $0x158] sm:$0xff]  ;;  %v105_v26 = vld [vmem:[#allocation2 + $0x150] sm:$0xff] }
  0x17   :  { %319 = vmatpush3.msra.mxu0 %v76_v13  ;;  %357 = vmatpush3.msra.mxu1 %v108_v14  ;;  %v88_v27 = vld [vmem:[#allocation2 + $0xc8] sm:$0xff]  ;;  %v87_v31 = vld [vmem:[#allocation2 + $0xc0] sm:$0xff]  ;;  %v86_v35 = vld [vmem:[#allocation2 + $0xb8] sm:$0xff] }
  0x18   :  { %320 = vmatprep.subr.mxu0 %v91_v15  ;;  %358 = vmatprep.subr.mxu1 %v123_v16  ;;  %v120_v28 = vld [vmem:[#allocation2 + $0x1c8] sm:$0xff]  ;;  %v119_v32 = vld [vmem:[#allocation2 + $0x1c0] sm:$0xff]  ;;  %v118_v36 = vld [vmem:[#allocation2 + $0x1b8] sm:$0xff] }
  0x19   :  { %321 = vmatpush3.msra.mxu0 %v75_v17  ;;  %359 = vmatpush3.msra.mxu1 %v107_v18  ;;  %v72_v29 = vld [vmem:[#allocation2 + $0x48] sm:$0xff]  ;;  %v71_v33 = vld [vmem:[#allocation2 + $0x40] sm:$0xff]  ;;  %v70_v37 = vld [vmem:[#allocation2 + $0x38] sm:$0xff] }
  0x1a   :  { %322 = vmatprep.subr.mxu0 %v90_v19  ;;  %360 = vmatprep.subr.mxu1 %v122_v20  ;;  %v104_v30 = vld [vmem:[#allocation2 + $0x148] sm:$0xff]  ;;  %v103_v34 = vld [vmem:[#allocation2 + $0x140] sm:$0xff]  ;;  %v102_v38 = vld [vmem:[#allocation2 + $0x138] sm:$0xff] }
  0x1b   :  { %323 = vmatpush3.msra.mxu0 %v74_v21  ;;  %361 = vmatpush3.msra.mxu1 %v106_v22  ;;  %v85_v39 = vld [vmem:[#allocation2 + $0xb0] sm:$0xff]  ;;  %v84_v43 = vld [vmem:[#allocation2 + $0xa8] sm:$0xff]  ;;  %v83_v47 = vld [vmem:[#allocation2 + $0xa0] sm:$0xff] }
  0x1c   :  { %324 = vmatprep.subr.mxu0 %v89_v23  ;;  %362 = vmatprep.subr.mxu1 %v121_v24  ;;  %v117_v40 = vld [vmem:[#allocation2 + $0x1b0] sm:$0xff]  ;;  %v116_v44 = vld [vmem:[#allocation2 + $0x1a8] sm:$0xff]  ;;  %v115_v48 = vld [vmem:[#allocation2 + $0x1a0] sm:$0xff] }
  0x1d   :  { %325 = vmatpush3.msra.mxu0 %v73_v25  ;;  %363 = vmatpush3.msra.mxu1 %v105_v26  ;;  %v69_v41 = vld [vmem:[#allocation2 + $0x30] sm:$0xff]  ;;  %v68_v45 = vld [vmem:[#allocation2 + $0x28] sm:$0xff]  ;;  %v67_v49 = vld [vmem:[#allocation2 + $0x20] sm:$0xff] }
  0x1e   :  { %326 = vmatprep.subr.mxu0 %v88_v27  ;;  %364 = vmatprep.subr.mxu1 %v120_v28  ;;  %v101_v42 = vld [vmem:[#allocation2 + $0x130] sm:$0xff]  ;;  %v100_v46 = vld [vmem:[#allocation2 + $0x128] sm:$0xff]  ;;  %v99_v50 = vld [vmem:[#allocation2 + $0x120] sm:$0xff] }
  0x1f   :  { %327 = vmatpush3.msra.mxu0 %v72_v29  ;;  %365 = vmatpush3.msra.mxu1 %v104_v30  ;;  %v82_v51 = vld [vmem:[#allocation2 + $0x98] sm:$0xff]  ;;  %v81_v55 = vld [vmem:[#allocation2 + $0x90] sm:$0xff]  ;;  %v80_v59 = vld [vmem:[#allocation2 + $0x88] sm:$0xff] }
  0x20   :  { %328 = vmatprep.subr.mxu0 %v87_v31  ;;  %366 = vmatprep.subr.mxu1 %v119_v32  ;;  %v114_v52 = vld [vmem:[#allocation2 + $0x198] sm:$0xff]  ;;  %v113_v56 = vld [vmem:[#allocation2 + $0x190] sm:$0xff]  ;;  %v112_v60 = vld [vmem:[#allocation2 + $0x188] sm:$0xff] }
  0x21   :  { %329 = vmatpush3.msra.mxu0 %v71_v33  ;;  %367 = vmatpush3.msra.mxu1 %v103_v34  ;;  %v66_v53 = vld [vmem:[#allocation2 + $0x18] sm:$0xff]  ;;  %v65_v57 = vld [vmem:[#allocation2 + $0x10] sm:$0xff]  ;;  %v64_v61 = vld [vmem:[#allocation2 + $0x8] sm:$0xff] }
  0x22   :  { %330 = vmatprep.subr.mxu0 %v86_v35  ;;  %368 = vmatprep.subr.mxu1 %v118_v36  ;;  %v98_v54 = vld [vmem:[#allocation2 + $0x118] sm:$0xff]  ;;  %v97_v58 = vld [vmem:[#allocation2 + $0x110] sm:$0xff]  ;;  %v96_v62 = vld [vmem:[#allocation2 + $0x108] sm:$0xff] }
  0x23   :  { %331 = vmatpush3.msra.mxu0 %v70_v37  ;;  %369 = vmatpush3.msra.mxu1 %v102_v38  ;;  %v79_v63 = vld [vmem:[#allocation2 + $0x80] sm:$0xff] }
  0x24   :  { %332 = vmatprep.subr.mxu0 %v85_v39  ;;  %370 = vmatprep.subr.mxu1 %v117_v40  ;;  %v111_v0 = vld [vmem:[#allocation2 + $0x180] sm:$0xff] }
  0x25   :  { %333 = vmatpush3.msra.mxu0 %v69_v41  ;;  %371 = vmatpush3.msra.mxu1 %v101_v42  ;;  %v63_v1 = vld [vmem:[#allocation2] sm:$0xff] }
  0x26   :  { %334 = vmatprep.subr.mxu0 %v84_v43  ;;  %372 = vmatprep.subr.mxu1 %v116_v44  ;;  %v95_v2 = vld [vmem:[#allocation2 + $0x100] sm:$0xff] }
  0x27   :  { %335 = vmatpush3.msra.mxu0 %v68_v45  ;;  %373 = vmatpush3.msra.mxu1 %v100_v46 }
  0x28   :  { %336 = vmatprep.subr.mxu0 %v83_v47  ;;  %374 = vmatprep.subr.mxu1 %v115_v48 }
  0x29   :  { %337 = vmatpush3.msra.mxu0 %v67_v49  ;;  %375 = vmatpush3.msra.mxu1 %v99_v50 }
  0x2a   :  { %338 = vmatprep.subr.mxu0 %v82_v51  ;;  %376 = vmatprep.subr.mxu1 %v114_v52 }
  0x2b   :  { %339 = vmatpush3.msra.mxu0 %v66_v53  ;;  %377 = vmatpush3.msra.mxu1 %v98_v54 }
  0x2c   :  { %340 = vmatprep.subr.mxu0 %v81_v55  ;;  %378 = vmatprep.subr.mxu1 %v113_v56 }
  0x2d   :  { %341 = vmatpush3.msra.mxu0 %v65_v57  ;;  %379 = vmatpush3.msra.mxu1 %v97_v58 }
  0x2e   :  { %342 = vmatprep.subr.mxu0 %v80_v59  ;;  %380 = vmatprep.subr.mxu1 %v112_v60 }
  0x2f   :  { %343 = vmatpush3.msra.mxu0 %v64_v61  ;;  %381 = vmatpush3.msra.mxu1 %v96_v62 }
  0x30   :  { %344 = vmatprep.subr.mxu0 %v79_v63  ;;  %382 = vmatprep.subr.mxu1 %v111_v0 }
  0x31   :  { %345 = vmatpush3.msra.mxu0 %v63_v1  ;;  %383 = vmatpush3.msra.mxu1 %v95_v2 }
  0x8b   :  { %v35_v8 = vpop.permute.xlu0 %34 }
  0x8c   :  { %vm40_vm0 = vcmp.eq.s32.totalorder %v30_v5, %v35_v8  ;;  %vm42_vm1 = vcmp.eq.s32.totalorder %v32_v6, %v35_v8  ;;  %vm39_vm2 = vcmp.eq.s32.totalorder %v29_v4, %v35_v8  ;;  %vm41_vm3 = vcmp.eq.s32.totalorder %v31_v7, %v35_v8 }
  0x8d   :  { %306 = vmatprep.mubr.msk.f32.mxu0 %vm40_vm0, %v445_v9  ;;  %310 = vmatprep.mubr.msk.f32.mxu1 %vm42_vm1, %v445_v9 }
  0x8e   :  { %307 = vmatmul.mubr.msk.f32.vlgmr.msra.gmra.mxu0 %vm39_vm2, %v445_v9  ;;  %311 = vmatmul.mubr.msk.f32.vlgmr.msra.gmra.mxu1 %vm41_vm3, %v445_v9 }
  0x90   :  { %v38_v10 = vpop.permute.xlu0 %37 }
  0x91   :  { %vm44_vm4 = vcmp.eq.s32.totalorder %v30_v5, %v38_v10  ;;  %vm46_vm5 = vcmp.eq.s32.totalorder %v32_v6, %v38_v10  ;;  %vm43_vm6 = vcmp.eq.s32.totalorder %v29_v4, %v38_v10  ;;  %vm45_vm7 = vcmp.eq.s32.totalorder %v31_v7, %v38_v10 }
  0x92   :  { %308 = vmatprep.mubr.msk.f32.mxu0 %vm44_vm4, %v445_v9  ;;  %312 = vmatprep.mubr.msk.f32.mxu1 %vm46_vm5, %v445_v9 }
  0x93   :  { %309 = vmatmul.mubr.msk.f32.gmra.mxu0 %vm43_vm6, %v445_v9  ;;  %313 = vmatmul.mubr.msk.f32.gmra.mxu1 %vm45_vm7, %v445_v9 }
 0x14e   :  { %v346_v11 = vpop.f32.mrf.mxu0  ;;  %v384_v12 = vpop.f32.mrf.mxu1 }
 0x150   :  { %v347_v13 = vpop.f32.mrf.mxu0  ;;  %v385_v14 = vpop.f32.mrf.mxu1 }
 0x151   :  { %v348_v15 = vadd.f32 %v347_v13, %v346_v11  ;;  %v386_v16 = vadd.f32 %v385_v14, %v384_v12 }
 0x153   :  { %v349_v17 = vpop.f32.mrf.mxu0  ;;  %v387_v18 = vpop.f32.mrf.mxu1  ;;  %v269_v19 = vadd.f32 %v386_v16, %v348_v15 }
 0x155   :  { %v350_v20 = vpop.f32.mrf.mxu0  ;;  %v388_v21 = vpop.f32.mrf.mxu1  ;;  %v277_v22 = vmul.f32 11.313708, %v269_v19 }
 0x156   :  { %v351_v23 = vadd.f32 %v350_v20, %v349_v17  ;;  %v389_v24 = vadd.f32 %v388_v21, %v387_v18 }
 0x157   :  { %279 = vst [vmem:[#allocation5] sm:$0xff] %v277_v22 }
 0x158   :  { %v274_v25 = vadd.f32 %v389_v24, %v351_v23 }
 0x15a   :  { %v278_v26 = vmul.f32 11.313708, %v274_v25 }
 0x15c   :  { %280 = vst [vmem:[#allocation5 + $0x8] sm:$0xff] %v278_v26 }
 0x15d   :  { %428 = shalt.err (!%p425_p9)
}
 0x15e   :  { %292 = dma.vmem_to_hbm [thread:$0]  %s287_s1, 256, %s482_s2, [#allocation4], %s442_s12, %s442_s12, %s443_s13  }
 0x15f   :  { %439 = dma.done.wait [#allocation4], 256  }
 0x160   :  { %440 = vsyncadd [#allocation4], 4294967040 }
 0x161   :  { %296 = vsyncpa [#allocation3], 1 }
 0x162   :  { %297 = vsyncpa [#allocation4], 1 }

</bundles_post_ra>
